<compile_context>
chip_gen: v7x
topology: tpu7x:2x2x1
jax: 0.10.0
libtpu: 0.0.40
codegen_flags: <defaults>
</compile_context>

<pallas_src>
import numpy as np
import jax
import jax.numpy as jnp
from jax.experimental import pallas as pl
from jax.experimental.pallas import tpu as pltpu  # noqa: F401  (kept for TPU-specific tuning hooks)

# ----- small configuration consistent with Decoder.__init__ -----
HIDDEN = 32     # hidden_dim (embedding dim / attention output dim)
VOCAB = 64      # output_dim
RNN = 32        # RNN_dim (unidirectional GRU); == HIDDEN as in the original config
DKV = 16        # attention_dkv
NH = 4          # MultiHead_Attention_N  (DKV % NH == 0)
SEQ = 8         # encoder memory length
DEC_LEN = 5     # number of teacher-forced decode steps

assert HIDDEN == RNN, "GRU input dim must equal RNN dim in this config"
assert DKV % NH == 0

OUT_W = 128                  # lane-dense output row: [probs(64) | h_t(32) | pad(32)]
OUT_PAD = OUT_W - VOCAB - RNN


# ------------------------------------------------------------------ kernel ---
def decoder_kernel(xs_ref, mem_ref, h0_ref, hmask_ref,
                   wq_ref, bq_ref, wkv_ref, bkv_ref, wo_ref, bo_ref,
                   wih_ref, bih_ref, whh_ref, bhh_ref, wout_ref, bout_ref,
                   out_ref):
    f32 = jnp.float32
    T = xs_ref.shape[0]

    xs = xs_ref[...]            # [T, HIDDEN]  embeddings(+PE) for all decode steps
    mem = mem_ref[...]          # [SEQ, RNN]   encoder memory
    hmask = hmask_ref[...]      # [NH, DKV]    0/1 channel->head masks (c % NH == h)

    # ---------- hidden-state-independent work, batched over all T steps ----------
    # Q projection (dk**-0.5 scale already folded into wq/bq at pack time).
    q_all = jnp.dot(xs, wq_ref[...], preferred_element_type=f32) + bq_ref[...]      # [T, DKV]

    # K/V projection: depends only on memory + weights -> computed exactly ONCE.
    kv = jnp.dot(mem, wkv_ref[...], preferred_element_type=f32) + bkv_ref[...]      # [SEQ, 2*DKV]
    k = kv[:, :DKV]
    v = kv[:, DKV:]

    # Multi-head source-target attention, head = channel % NH, expressed as
    # per-head channel masks (VPU) + 2D MXU matmuls; softmax over SEQ per head.
    # `pad_mask * sys.float_info.min` underflows to 0 in fp32 -> exact no-op (skipped).
    feat = jnp.zeros((T, DKV), f32)
    for h in range(NH):                                   # NH = 4, unrolled at trace time
        mh = hmask[h:h + 1, :]                            # [1, DKV]
        qh = q_all * mh                                   # [T, DKV] (non-head channels zeroed)
        logits = jax.lax.dot_general(                     # [T, SEQ] = qh @ k^T
            qh, k, (((1,), (1,)), ((), ())), preferred_element_type=f32)
        mmax = jnp.max(logits, axis=-1, keepdims=True)
        e = jnp.exp(logits - mmax)
        inv = pl.reciprocal(jnp.sum(e, axis=-1, keepdims=True), approx=True)
        wgt = e * inv                                     # softmax over SEQ
        feat = feat + jnp.dot(wgt, v * mh, preferred_element_type=f32)               # [T, DKV]

    attn_all = jnp.dot(feat, wo_ref[...], preferred_element_type=f32) + bo_ref[...]  # [T, HIDDEN]
    gi_all = jnp.dot(attn_all, wih_ref[...], preferred_element_type=f32) + bih_ref[...]  # [T, 3*RNN]

    # ---------- serial GRU recurrence (only h-dependent work), T unrolled ----------
    whh = whh_ref[...]
    bhh = bhh_ref[...]
    h = h0_ref[...]                                       # [1, RNN]
    hs = []
    for t in range(T):
        gh = jnp.dot(h, whh, preferred_element_type=f32) + bhh                      # [1, 3*RNN]
        gi = gi_all[t:t + 1, :]                                                      # [1, 3*RNN]
        r = jax.nn.sigmoid(gi[:, :RNN] + gh[:, :RNN])
        z = jax.nn.sigmoid(gi[:, RNN:2 * RNN] + gh[:, RNN:2 * RNN])
        n = jnp.tanh(gi[:, 2 * RNN:] + r * gh[:, 2 * RNN:])
        h = (1.0 - z) * n + z * h
        hs.append(h)
    h_all = jnp.concatenate(hs, axis=0)                   # [T, RNN]

    # ---------- batched output projection + softmax (exact divide) ----------
    o = jnp.dot(h_all, wout_ref[...], preferred_element_type=f32) + bout_ref[...]   # [T, VOCAB]
    mo = jnp.max(o, axis=-1, keepdims=True)
    eo = jnp.exp(o - mo)
    probs = eo / jnp.sum(eo, axis=-1, keepdims=True)

    # single lane-dense [T, 128] store: [probs | h_t | pad]
    out_ref[...] = jnp.concatenate(
        [probs, h_all, jnp.zeros((T, OUT_PAD), f32)], axis=-1)


def _forward_impl(packed, tokens, hidden, memory_encoder):
    T = tokens.shape[0]
    xs = packed['emb_pe'][tokens]                                  # [T, HIDDEN] gather + PE (fused)
    mem = memory_encoder[0] if memory_encoder.ndim > 2 else memory_encoder
    h0 = hidden.reshape(1, RNN)

    # Grid-less call: every input is DMA'd once into VMEM and stays resident;
    # the whole decode runs in a single kernel invocation (no per-step grid
    # overhead, no double-buffering bookkeeping).
    # TODO(synk): if a batch/multi-sequence dim is ever added, expose it as a
    # leading "parallel" grid axis so v7x can shard it across its two TCs.
    out = pl.pallas_call(
        decoder_kernel,
        out_shape=jax.ShapeDtypeStruct((T, OUT_W), jnp.float32),
    )(xs, mem, h0, packed['hmask'],
      packed['Wq_s'], packed['bq_s'],
      packed['Wkv'], packed['bkv'],
      packed['Wo'], packed['bo'],
      packed['W_ih'], packed['b_ih'],
      packed['W_hh'], packed['b_hh'],
      packed['W_out'], packed['b_out'])

    probs = out[:, :VOCAB]                        # [T, VOCAB] per-step softmax outputs
    h_all = out[:, VOCAB:VOCAB + RNN]             # [T, RNN]   per-step hidden states
    h_last = h_all[-1].reshape(1, 1, RNN)
    return probs, h_last, h_all


_forward_jit = jax.jit(_forward_impl)


def decoder_forward(packed, tokens, hidden, memory_encoder, memory_decoder=None):
    """T teacher-forced Decoder.forward steps in one grid-less pallas_call.

    memory_decoder is accepted for interface fidelity; in the original module
    (no self-attention) its embedding + positional encoding is dead work, so it
    is intentionally not computed here.
    """
    del memory_decoder
    tokens = jnp.asarray(tokens).reshape(-1)
    probs, h_last, _ = _forward_jit(packed, tokens, hidden, memory_encoder)
    return probs, h_last, None


# ------------------------------------------------------------------- glue ---
def positional_encoding(shape):
    # mirrors PositionalEncoding.forward (numpy, torch-identical formula)
    mb, seq, dim = shape
    pe = np.zeros([mb, seq, dim], dtype=np.float32)
    pos = np.arange(seq).repeat(dim).reshape(-1, dim)
    dix = np.tile(np.arange(dim), [seq, 1])
    pe[:, :, 0::2] = np.sin(pos[:, 0::2] / 10000 ** (2 * dix[:, 0::2] / dim))
    pe[:, :, 1::2] = np.cos(pos[:, 1::2] / 10000 ** (2 * dix[:, 1::2] / dim))
    return jnp.asarray(pe)


def init_params(key):
    ks = jax.random.split(key, 16)

    def w(k, shape, scale=0.1):
        return jax.random.normal(k, shape, jnp.float32) * scale

    return dict(
        embedding=w(ks[0], (VOCAB, HIDDEN), 1.0),
        Wq=w(ks[1], (HIDDEN, DKV)), bq=w(ks[2], (1, DKV)),
        Wk=w(ks[3], (RNN, DKV)),    bk=w(ks[4], (1, DKV)),
        Wv=w(ks[5], (RNN, DKV)),    bv=w(ks[6], (1, DKV)),
        Wo=w(ks[7], (DKV, HIDDEN)), bo=w(ks[8], (1, HIDDEN)),
        W_ih=w(ks[9], (HIDDEN, 3 * RNN)), b_ih=w(ks[10], (1, 3 * RNN)),
        W_hh=w(ks[11], (RNN, 3 * RNN)),   b_hh=w(ks[12], (1, 3 * RNN)),
        W_out=w(ks[13], (RNN, VOCAB)),    b_out=w(ks[14], (1, VOCAB)),
    )


def pack_params(p):
    """Prepare kernel inputs: fold the position-0 positional-encoding row into
    the embedding table, fold dk**-0.5 into Wq/bq, fuse K|V, and precompute
    the per-head 0/1 channel masks (head = channel % NH)."""
    pe0 = positional_encoding((1, 1, HIDDEN))[0, 0]                 # [HIDDEN]
    emb_pe = p['embedding'] + pe0[None, :]

    dk = DKV // NH
    scale = dk ** -0.5
    hmask = (np.arange(DKV)[None, :] % NH == np.arange(NH)[:, None]).astype(np.float32)  # [NH, DKV]

    return dict(
        emb_pe=emb_pe,
        hmask=jnp.asarray(hmask),
        Wq_s=p['Wq'] * scale, bq_s=p['bq'] * scale,
        Wkv=jnp.concatenate([p['Wk'], p['Wv']], axis=1),
        bkv=jnp.concatenate([p['bk'], p['bv']], axis=1),
        Wo=p['Wo'], bo=p['bo'],
        W_ih=p['W_ih'], b_ih=p['b_ih'],
        W_hh=p['W_hh'], b_hh=p['b_hh'],
        W_out=p['W_out'], b_out=p['b_out'],
    )


# --------------------------------------------------- pure-JAX reference ---
def decoder_reference_step(params, tok, h0, mem, pe0):
    """One Decoder.forward step (torch-faithful view/permute head split)."""
    x = params['embedding'][tok] + pe0
    dk = DKV // NH
    q = (x.reshape(1, -1) @ params['Wq'] + params['bq'])
    q = q.reshape(1, dk, NH).transpose(2, 0, 1) * dk ** -0.5              # [NH,1,dk]
    k = (mem @ params['Wk'] + params['bk']).reshape(SEQ, dk, NH).transpose(2, 1, 0)
    qk = jnp.einsum('hij,hjs->his', q, k)
    wgt = jax.nn.softmax(qk, axis=-1)
    v = (mem @ params['Wv'] + params['bv']).reshape(SEQ, dk, NH).transpose(2, 0, 1)
    feat = jnp.einsum('his,hsd->hid', wgt, v).transpose(1, 2, 0).reshape(1, DKV)
    attn = feat @ params['Wo'] + params['bo']
    gi = attn @ params['W_ih'] + params['b_ih']
    gh = h0 @ params['W_hh'] + params['b_hh']
    r = jax.nn.sigmoid(gi[:, :RNN] + gh[:, :RNN])
    z = jax.nn.sigmoid(gi[:, RNN:2 * RNN] + gh[:, RNN:2 * RNN])
    n = jnp.tanh(gi[:, 2 * RNN:] + r * gh[:, 2 * RNN:])
    h_new = (1.0 - z) * n + z * h0
    probs = jax.nn.softmax(h_new @ params['W_out'] + params['b_out'], axis=-1)
    return probs, h_new


if __name__ == "__main__":
    key = jax.random.PRNGKey(0)
    kp, kx, kh, km, kd = jax.random.split(key, 5)
    params = init_params(kp)
    packed = pack_params(params)

    tokens = jax.random.randint(kx, (DEC_LEN,), 0, VOCAB)                  # teacher-forced decoder inputs
    hidden = jax.random.normal(kh, (1, 1, RNN), jnp.float32) * 0.1         # initial GRU hidden state
    memory_encoder = jax.random.normal(km, (1, SEQ, RNN), jnp.float32) * 0.5
    memory_decoder = jax.random.randint(kd, (1, DEC_LEN), 0, VOCAB)        # unused (no self-attention)

    probs, h_last, _ = decoder_forward(packed, tokens, hidden, memory_encoder, memory_decoder)
    jax.block_until_ready((probs, h_last))

    # reference: loop the torch-faithful single-step math, carrying the hidden state
    pe0 = positional_encoding((1, 1, HIDDEN))[0, 0]
    h = hidden.reshape(1, RNN)
    mem = memory_encoder[0]
    ref_rows = []
    for i in range(DEC_LEN):
        p_i, h = decoder_reference_step(params, int(tokens[i]), h, mem, pe0)
        ref_rows.append(p_i)
    ref_probs = jnp.concatenate(ref_rows, axis=0)
    ref_h_last = h.reshape(1, 1, RNN)

    assert probs.shape == (DEC_LEN, VOCAB) and h_last.shape == (1, 1, RNN)
    assert jnp.allclose(probs, ref_probs, atol=1e-4, rtol=1e-3)
    assert jnp.allclose(h_last, ref_h_last, atol=1e-4, rtol=1e-3)
    assert jnp.allclose(jnp.sum(probs, axis=-1), jnp.ones((DEC_LEN,)), atol=1e-3)
    print("KERNEL_OK")
</pallas_src>

<mosaic_0001>
module attributes {stable_mosaic.version = 11 : i64} {
  func.func @decoder_kernel(%arg0: memref<5x32xf32, #tpu.memory_space<vmem>>, %arg1: memref<8x32xf32, #tpu.memory_space<vmem>>, %arg2: memref<1x32xf32, #tpu.memory_space<vmem>>, %arg3: memref<4x16xf32, #tpu.memory_space<vmem>>, %arg4: memref<32x16xf32, #tpu.memory_space<vmem>>, %arg5: memref<1x16xf32, #tpu.memory_space<vmem>>, %arg6: memref<32x32xf32, #tpu.memory_space<vmem>>, %arg7: memref<1x32xf32, #tpu.memory_space<vmem>>, %arg8: memref<16x32xf32, #tpu.memory_space<vmem>>, %arg9: memref<1x32xf32, #tpu.memory_space<vmem>>, %arg10: memref<32x96xf32, #tpu.memory_space<vmem>>, %arg11: memref<1x96xf32, #tpu.memory_space<vmem>>, %arg12: memref<32x96xf32, #tpu.memory_space<vmem>>, %arg13: memref<1x96xf32, #tpu.memory_space<vmem>>, %arg14: memref<32x64xf32, #tpu.memory_space<vmem>>, %arg15: memref<1x64xf32, #tpu.memory_space<vmem>>, %arg16: memref<5x128xf32, #tpu.memory_space<vmem>>) attributes {dimension_semantics = [], scalar_prefetch = 0 : i64, scratch_operands = 0 : i64, tpu.core_type = #tpu.core_type<tc>} {
    %c0 = arith.constant 0 : index
    %c0_0 = arith.constant 0 : index
    %0 = vector.load %arg0[%c0, %c0_0] : memref<5x32xf32, #tpu.memory_space<vmem>>, vector<5x32xf32>
    %c0_1 = arith.constant 0 : index
    %c0_2 = arith.constant 0 : index
    %1 = vector.load %arg1[%c0_1, %c0_2] : memref<8x32xf32, #tpu.memory_space<vmem>>, vector<8x32xf32>
    %c0_3 = arith.constant 0 : index
    %c0_4 = arith.constant 0 : index
    %2 = vector.load %arg3[%c0_3, %c0_4] : memref<4x16xf32, #tpu.memory_space<vmem>>, vector<4x16xf32>
    %c0_5 = arith.constant 0 : index
    %c0_6 = arith.constant 0 : index
    %3 = vector.load %arg4[%c0_5, %c0_6] : memref<32x16xf32, #tpu.memory_space<vmem>>, vector<32x16xf32>
    %cst = arith.constant dense<0.000000e+00> : vector<5x16xf32>
    %4 = tpu.matmul %0, %3, %cst {dimension_numbers = #tpu.dot_dimension_numbers<[1], [0], [0], [1], [0, 0, 1, 1], [], []>} : vector<5x32xf32>, vector<32x16xf32>, vector<5x16xf32> -> vector<5x16xf32>
    %c0_7 = arith.constant 0 : index
    %c0_8 = arith.constant 0 : index
    %5 = vector.load %arg5[%c0_7, %c0_8] : memref<1x16xf32, #tpu.memory_space<vmem>>, vector<1x16xf32>
    %6 = vector.broadcast %5 : vector<1x16xf32> to vector<5x16xf32>
    %7 = arith.addf %4, %6 : vector<5x16xf32>
    %c0_9 = arith.constant 0 : index
    %c0_10 = arith.constant 0 : index
    %8 = vector.load %arg6[%c0_9, %c0_10] : memref<32x32xf32, #tpu.memory_space<vmem>>, vector<32x32xf32>
    %cst_11 = arith.constant dense<0.000000e+00> : vector<8x32xf32>
    %9 = tpu.matmul %1, %8, %cst_11 {dimension_numbers = #tpu.dot_dimension_numbers<[1], [0], [0], [1], [0, 0, 1, 1], [], []>} : vector<8x32xf32>, vector<32x32xf32>, vector<8x32xf32> -> vector<8x32xf32>
    %c0_12 = arith.constant 0 : index
    %c0_13 = arith.constant 0 : index
    %10 = vector.load %arg7[%c0_12, %c0_13] : memref<1x32xf32, #tpu.memory_space<vmem>>, vector<1x32xf32>
    %11 = vector.broadcast %10 : vector<1x32xf32> to vector<8x32xf32>
    %12 = arith.addf %9, %11 : vector<8x32xf32>
    %13 = vector.extract_strided_slice %12 {offsets = [0, 0], sizes = [8, 16], strides = [1, 1]} : vector<8x32xf32> to vector<8x16xf32>
    %14 = vector.extract_strided_slice %12 {offsets = [0, 16], sizes = [8, 16], strides = [1, 1]} : vector<8x32xf32> to vector<8x16xf32>
    %cst_14 = arith.constant 0.000000e+00 : f32
    %15 = vector.broadcast %cst_14 : f32 to vector<5x16xf32>
    %16 = vector.extract_strided_slice %2 {offsets = [0, 0], sizes = [1, 16], strides = [1, 1]} : vector<4x16xf32> to vector<1x16xf32>
    %17 = vector.broadcast %16 : vector<1x16xf32> to vector<5x16xf32>
    %18 = arith.mulf %7, %17 : vector<5x16xf32>
    %cst_15 = arith.constant dense<0.000000e+00> : vector<5x8xf32>
    %19 = tpu.matmul %18, %13, %cst_15 {dimension_numbers = #tpu.dot_dimension_numbers<[1], [1], [0], [0], [0, 0, 1, 0], [], []>} : vector<5x16xf32>, vector<8x16xf32>, vector<5x8xf32> -> vector<5x8xf32>
    %cst_16 = arith.constant dense<0xFF800000> : vector<5xf32>
    %20 = vector.multi_reduction <maximumf>, %19, %cst_16 [1] : vector<5x8xf32> to vector<5xf32>
    %21 = vector.shape_cast %20 : vector<5xf32> to vector<5x1xf32>
    %22 = vector.broadcast %21 : vector<5x1xf32> to vector<5x8xf32>
    %23 = arith.subf %19, %22 : vector<5x8xf32>
    %24 = math.exp %23 : vector<5x8xf32>
    %cst_17 = arith.constant dense<0.000000e+00> : vector<5xf32>
    %25 = vector.multi_reduction <add>, %24, %cst_17 [1] : vector<5x8xf32> to vector<5xf32>
    %26 = vector.shape_cast %25 : vector<5xf32> to vector<5x1xf32>
    %27 = tpu.reciprocal %26 {approx = true} : vector<5x1xf32> -> vector<5x1xf32>
    %28 = vector.broadcast %27 : vector<5x1xf32> to vector<5x8xf32>
    %29 = arith.mulf %24, %28 : vector<5x8xf32>
    %30 = vector.broadcast %16 : vector<1x16xf32> to vector<8x16xf32>
    %31 = arith.mulf %14, %30 : vector<8x16xf32>
    %cst_18 = arith.constant dense<0.000000e+00> : vector<5x16xf32>
    %32 = tpu.matmul %29, %31, %cst_18 {dimension_numbers = #tpu.dot_dimension_numbers<[1], [0], [0], [1], [0, 0, 1, 1], [], []>} : vector<5x8xf32>, vector<8x16xf32>, vector<5x16xf32> -> vector<5x16xf32>
    %33 = arith.addf %15, %32 : vector<5x16xf32>
    %34 = vector.extract_strided_slice %2 {offsets = [1, 0], sizes = [1, 16], strides = [1, 1]} : vector<4x16xf32> to vector<1x16xf32>
    %35 = vector.broadcast %34 : vector<1x16xf32> to vector<5x16xf32>
    %36 = arith.mulf %7, %35 : vector<5x16xf32>
    %cst_19 = arith.constant dense<0.000000e+00> : vector<5x8xf32>
    %37 = tpu.matmul %36, %13, %cst_19 {dimension_numbers = #tpu.dot_dimension_numbers<[1], [1], [0], [0], [0, 0, 1, 0], [], []>} : vector<5x16xf32>, vector<8x16xf32>, vector<5x8xf32> -> vector<5x8xf32>
    %cst_20 = arith.constant dense<0xFF800000> : vector<5xf32>
    %38 = vector.multi_reduction <maximumf>, %37, %cst_20 [1] : vector<5x8xf32> to vector<5xf32>
    %39 = vector.shape_cast %38 : vector<5xf32> to vector<5x1xf32>
    %40 = vector.broadcast %39 : vector<5x1xf32> to vector<5x8xf32>
    %41 = arith.subf %37, %40 : vector<5x8xf32>
    %42 = math.exp %41 : vector<5x8xf32>
    %cst_21 = arith.constant dense<0.000000e+00> : vector<5xf32>
    %43 = vector.multi_reduction <add>, %42, %cst_21 [1] : vector<5x8xf32> to vector<5xf32>
    %44 = vector.shape_cast %43 : vector<5xf32> to vector<5x1xf32>
    %45 = tpu.reciprocal %44 {approx = true} : vector<5x1xf32> -> vector<5x1xf32>
    %46 = vector.broadcast %45 : vector<5x1xf32> to vector<5x8xf32>
    %47 = arith.mulf %42, %46 : vector<5x8xf32>
    %48 = vector.broadcast %34 : vector<1x16xf32> to vector<8x16xf32>
    %49 = arith.mulf %14, %48 : vector<8x16xf32>
    %cst_22 = arith.constant dense<0.000000e+00> : vector<5x16xf32>
    %50 = tpu.matmul %47, %49, %cst_22 {dimension_numbers = #tpu.dot_dimension_numbers<[1], [0], [0], [1], [0, 0, 1, 1], [], []>} : vector<5x8xf32>, vector<8x16xf32>, vector<5x16xf32> -> vector<5x16xf32>
    %51 = arith.addf %33, %50 : vector<5x16xf32>
    %52 = vector.extract_strided_slice %2 {offsets = [2, 0], sizes = [1, 16], strides = [1, 1]} : vector<4x16xf32> to vector<1x16xf32>
    %53 = vector.broadcast %52 : vector<1x16xf32> to vector<5x16xf32>
    %54 = arith.mulf %7, %53 : vector<5x16xf32>
    %cst_23 = arith.constant dense<0.000000e+00> : vector<5x8xf32>
    %55 = tpu.matmul %54, %13, %cst_23 {dimension_numbers = #tpu.dot_dimension_numbers<[1], [1], [0], [0], [0, 0, 1, 0], [], []>} : vector<5x16xf32>, vector<8x16xf32>, vector<5x8xf32> -> vector<5x8xf32>
    %cst_24 = arith.constant dense<0xFF800000> : vector<5xf32>
    %56 = vector.multi_reduction <maximumf>, %55, %cst_24 [1] : vector<5x8xf32> to vector<5xf32>
    %57 = vector.shape_cast %56 : vector<5xf32> to vector<5x1xf32>
    %58 = vector.broadcast %57 : vector<5x1xf32> to vector<5x8xf32>
    %59 = arith.subf %55, %58 : vector<5x8xf32>
    %60 = math.exp %59 : vector<5x8xf32>
    %cst_25 = arith.constant dense<0.000000e+00> : vector<5xf32>
    %61 = vector.multi_reduction <add>, %60, %cst_25 [1] : vector<5x8xf32> to vector<5xf32>
    %62 = vector.shape_cast %61 : vector<5xf32> to vector<5x1xf32>
    %63 = tpu.reciprocal %62 {approx = true} : vector<5x1xf32> -> vector<5x1xf32>
    %64 = vector.broadcast %63 : vector<5x1xf32> to vector<5x8xf32>
    %65 = arith.mulf %60, %64 : vector<5x8xf32>
    %66 = vector.broadcast %52 : vector<1x16xf32> to vector<8x16xf32>
    %67 = arith.mulf %14, %66 : vector<8x16xf32>
    %cst_26 = arith.constant dense<0.000000e+00> : vector<5x16xf32>
    %68 = tpu.matmul %65, %67, %cst_26 {dimension_numbers = #tpu.dot_dimension_numbers<[1], [0], [0], [1], [0, 0, 1, 1], [], []>} : vector<5x8xf32>, vector<8x16xf32>, vector<5x16xf32> -> vector<5x16xf32>
    %69 = arith.addf %51, %68 : vector<5x16xf32>
    %70 = vector.extract_strided_slice %2 {offsets = [3, 0], sizes = [1, 16], strides = [1, 1]} : vector<4x16xf32> to vector<1x16xf32>
    %71 = vector.broadcast %70 : vector<1x16xf32> to vector<5x16xf32>
    %72 = arith.mulf %7, %71 : vector<5x16xf32>
    %cst_27 = arith.constant dense<0.000000e+00> : vector<5x8xf32>
    %73 = tpu.matmul %72, %13, %cst_27 {dimension_numbers = #tpu.dot_dimension_numbers<[1], [1], [0], [0], [0, 0, 1, 0], [], []>} : vector<5x16xf32>, vector<8x16xf32>, vector<5x8xf32> -> vector<5x8xf32>
    %cst_28 = arith.constant dense<0xFF800000> : vector<5xf32>
    %74 = vector.multi_reduction <maximumf>, %73, %cst_28 [1] : vector<5x8xf32> to vector<5xf32>
    %75 = vector.shape_cast %74 : vector<5xf32> to vector<5x1xf32>
    %76 = vector.broadcast %75 : vector<5x1xf32> to vector<5x8xf32>
    %77 = arith.subf %73, %76 : vector<5x8xf32>
    %78 = math.exp %77 : vector<5x8xf32>
    %cst_29 = arith.constant dense<0.000000e+00> : vector<5xf32>
    %79 = vector.multi_reduction <add>, %78, %cst_29 [1] : vector<5x8xf32> to vector<5xf32>
    %80 = vector.shape_cast %79 : vector<5xf32> to vector<5x1xf32>
    %81 = tpu.reciprocal %80 {approx = true} : vector<5x1xf32> -> vector<5x1xf32>
    %82 = vector.broadcast %81 : vector<5x1xf32> to vector<5x8xf32>
    %83 = arith.mulf %78, %82 : vector<5x8xf32>
    %84 = vector.broadcast %70 : vector<1x16xf32> to vector<8x16xf32>
    %85 = arith.mulf %14, %84 : vector<8x16xf32>
    %cst_30 = arith.constant dense<0.000000e+00> : vector<5x16xf32>
    %86 = tpu.matmul %83, %85, %cst_30 {dimension_numbers = #tpu.dot_dimension_numbers<[1], [0], [0], [1], [0, 0, 1, 1], [], []>} : vector<5x8xf32>, vector<8x16xf32>, vector<5x16xf32> -> vector<5x16xf32>
    %87 = arith.addf %69, %86 : vector<5x16xf32>
    %c0_31 = arith.constant 0 : index
    %c0_32 = arith.constant 0 : index
    %88 = vector.load %arg8[%c0_31, %c0_32] : memref<16x32xf32, #tpu.memory_space<vmem>>, vector<16x32xf32>
    %cst_33 = arith.constant dense<0.000000e+00> : vector<5x32xf32>
    %89 = tpu.matmul %87, %88, %cst_33 {dimension_numbers = #tpu.dot_dimension_numbers<[1], [0], [0], [1], [0, 0, 1, 1], [], []>} : vector<5x16xf32>, vector<16x32xf32>, vector<5x32xf32> -> vector<5x32xf32>
    %c0_34 = arith.constant 0 : index
    %c0_35 = arith.constant 0 : index
    %90 = vector.load %arg9[%c0_34, %c0_35] : memref<1x32xf32, #tpu.memory_space<vmem>>, vector<1x32xf32>
    %91 = vector.broadcast %90 : vector<1x32xf32> to vector<5x32xf32>
    %92 = arith.addf %89, %91 : vector<5x32xf32>
    %c0_36 = arith.constant 0 : index
    %c0_37 = arith.constant 0 : index
    %93 = vector.load %arg10[%c0_36, %c0_37] : memref<32x96xf32, #tpu.memory_space<vmem>>, vector<32x96xf32>
    %cst_38 = arith.constant dense<0.000000e+00> : vector<5x96xf32>
    %94 = tpu.matmul %92, %93, %cst_38 {dimension_numbers = #tpu.dot_dimension_numbers<[1], [0], [0], [1], [0, 0, 1, 1], [], []>} : vector<5x32xf32>, vector<32x96xf32>, vector<5x96xf32> -> vector<5x96xf32>
    %c0_39 = arith.constant 0 : index
    %c0_40 = arith.constant 0 : index
    %95 = vector.load %arg11[%c0_39, %c0_40] : memref<1x96xf32, #tpu.memory_space<vmem>>, vector<1x96xf32>
    %96 = vector.broadcast %95 : vector<1x96xf32> to vector<5x96xf32>
    %97 = arith.addf %94, %96 : vector<5x96xf32>
    %c0_41 = arith.constant 0 : index
    %c0_42 = arith.constant 0 : index
    %98 = vector.load %arg12[%c0_41, %c0_42] : memref<32x96xf32, #tpu.memory_space<vmem>>, vector<32x96xf32>
    %c0_43 = arith.constant 0 : index
    %c0_44 = arith.constant 0 : index
    %99 = vector.load %arg13[%c0_43, %c0_44] : memref<1x96xf32, #tpu.memory_space<vmem>>, vector<1x96xf32>
    %c0_45 = arith.constant 0 : index
    %c0_46 = arith.constant 0 : index
    %100 = vector.load %arg2[%c0_45, %c0_46] : memref<1x32xf32, #tpu.memory_space<vmem>>, vector<1x32xf32>
    %cst_47 = arith.constant dense<0.000000e+00> : vector<1x96xf32>
    %101 = tpu.matmul %100, %98, %cst_47 {dimension_numbers = #tpu.dot_dimension_numbers<[1], [0], [0], [1], [0, 0, 1, 1], [], []>} : vector<1x32xf32>, vector<32x96xf32>, vector<1x96xf32> -> vector<1x96xf32>
    %102 = arith.addf %101, %99 : vector<1x96xf32>
    %103 = vector.extract_strided_slice %97 {offsets = [0, 0], sizes = [1, 96], strides = [1, 1]} : vector<5x96xf32> to vector<1x96xf32>
    %104 = vector.extract_strided_slice %103 {offsets = [0, 0], sizes = [1, 32], strides = [1, 1]} : vector<1x96xf32> to vector<1x32xf32>
    %105 = vector.extract_strided_slice %102 {offsets = [0, 0], sizes = [1, 32], strides = [1, 1]} : vector<1x96xf32> to vector<1x32xf32>
    %106 = arith.addf %104, %105 : vector<1x32xf32>
    %107 = arith.negf %106 : vector<1x32xf32>
    %108 = math.exp %107 : vector<1x32xf32>
    %cst_48 = arith.constant 1.000000e+00 : f32
    %109 = vector.broadcast %cst_48 : f32 to vector<1x32xf32>
    %110 = arith.addf %109, %108 : vector<1x32xf32>
    %111 = arith.divf %109, %110 : vector<1x32xf32>
    %112 = vector.extract_strided_slice %103 {offsets = [0, 32], sizes = [1, 32], strides = [1, 1]} : vector<1x96xf32> to vector<1x32xf32>
    %113 = vector.extract_strided_slice %102 {offsets = [0, 32], sizes = [1, 32], strides = [1, 1]} : vector<1x96xf32> to vector<1x32xf32>
    %114 = arith.addf %112, %113 : vector<1x32xf32>
    %115 = arith.negf %114 : vector<1x32xf32>
    %116 = math.exp %115 : vector<1x32xf32>
    %cst_49 = arith.constant 1.000000e+00 : f32
    %117 = vector.broadcast %cst_49 : f32 to vector<1x32xf32>
    %118 = arith.addf %117, %116 : vector<1x32xf32>
    %119 = arith.divf %117, %118 : vector<1x32xf32>
    %120 = vector.extract_strided_slice %103 {offsets = [0, 64], sizes = [1, 32], strides = [1, 1]} : vector<1x96xf32> to vector<1x32xf32>
    %121 = vector.extract_strided_slice %102 {offsets = [0, 64], sizes = [1, 32], strides = [1, 1]} : vector<1x96xf32> to vector<1x32xf32>
    %122 = arith.mulf %111, %121 : vector<1x32xf32>
    %123 = arith.addf %120, %122 : vector<1x32xf32>
    %124 = math.tanh %123 : vector<1x32xf32>
    %cst_50 = arith.constant 1.000000e+00 : f32
    %125 = vector.broadcast %cst_50 : f32 to vector<1x32xf32>
    %126 = arith.subf %125, %119 : vector<1x32xf32>
    %127 = arith.mulf %126, %124 : vector<1x32xf32>
    %128 = arith.mulf %119, %100 : vector<1x32xf32>
    %129 = arith.addf %127, %128 : vector<1x32xf32>
    %cst_51 = arith.constant dense<0.000000e+00> : vector<1x96xf32>
    %130 = tpu.matmul %129, %98, %cst_51 {dimension_numbers = #tpu.dot_dimension_numbers<[1], [0], [0], [1], [0, 0, 1, 1], [], []>} : vector<1x32xf32>, vector<32x96xf32>, vector<1x96xf32> -> vector<1x96xf32>
    %131 = arith.addf %130, %99 : vector<1x96xf32>
    %132 = vector.extract_strided_slice %97 {offsets = [1, 0], sizes = [1, 96], strides = [1, 1]} : vector<5x96xf32> to vector<1x96xf32>
    %133 = vector.extract_strided_slice %132 {offsets = [0, 0], sizes = [1, 32], strides = [1, 1]} : vector<1x96xf32> to vector<1x32xf32>
    %134 = vector.extract_strided_slice %131 {offsets = [0, 0], sizes = [1, 32], strides = [1, 1]} : vector<1x96xf32> to vector<1x32xf32>
    %135 = arith.addf %133, %134 : vector<1x32xf32>
    %136 = arith.negf %135 : vector<1x32xf32>
    %137 = math.exp %136 : vector<1x32xf32>
    %cst_52 = arith.constant 1.000000e+00 : f32
    %138 = vector.broadcast %cst_52 : f32 to vector<1x32xf32>
    %139 = arith.addf %138, %137 : vector<1x32xf32>
    %140 = arith.divf %138, %139 : vector<1x32xf32>
    %141 = vector.extract_strided_slice %132 {offsets = [0, 32], sizes = [1, 32], strides = [1, 1]} : vector<1x96xf32> to vector<1x32xf32>
    %142 = vector.extract_strided_slice %131 {offsets = [0, 32], sizes = [1, 32], strides = [1, 1]} : vector<1x96xf32> to vector<1x32xf32>
    %143 = arith.addf %141, %142 : vector<1x32xf32>
    %144 = arith.negf %143 : vector<1x32xf32>
    %145 = math.exp %144 : vector<1x32xf32>
    %cst_53 = arith.constant 1.000000e+00 : f32
    %146 = vector.broadcast %cst_53 : f32 to vector<1x32xf32>
    %147 = arith.addf %146, %145 : vector<1x32xf32>
    %148 = arith.divf %146, %147 : vector<1x32xf32>
    %149 = vector.extract_strided_slice %132 {offsets = [0, 64], sizes = [1, 32], strides = [1, 1]} : vector<1x96xf32> to vector<1x32xf32>
    %150 = vector.extract_strided_slice %131 {offsets = [0, 64], sizes = [1, 32], strides = [1, 1]} : vector<1x96xf32> to vector<1x32xf32>
    %151 = arith.mulf %140, %150 : vector<1x32xf32>
    %152 = arith.addf %149, %151 : vector<1x32xf32>
    %153 = math.tanh %152 : vector<1x32xf32>
    %cst_54 = arith.constant 1.000000e+00 : f32
    %154 = vector.broadcast %cst_54 : f32 to vector<1x32xf32>
    %155 = arith.subf %154, %148 : vector<1x32xf32>
    %156 = arith.mulf %155, %153 : vector<1x32xf32>
    %157 = arith.mulf %148, %129 : vector<1x32xf32>
    %158 = arith.addf %156, %157 : vector<1x32xf32>
    %cst_55 = arith.constant dense<0.000000e+00> : vector<1x96xf32>
    %159 = tpu.matmul %158, %98, %cst_55 {dimension_numbers = #tpu.dot_dimension_numbers<[1], [0], [0], [1], [0, 0, 1, 1], [], []>} : vector<1x32xf32>, vector<32x96xf32>, vector<1x96xf32> -> vector<1x96xf32>
    %160 = arith.addf %159, %99 : vector<1x96xf32>
    %161 = vector.extract_strided_slice %97 {offsets = [2, 0], sizes = [1, 96], strides = [1, 1]} : vector<5x96xf32> to vector<1x96xf32>
    %162 = vector.extract_strided_slice %161 {offsets = [0, 0], sizes = [1, 32], strides = [1, 1]} : vector<1x96xf32> to vector<1x32xf32>
    %163 = vector.extract_strided_slice %160 {offsets = [0, 0], sizes = [1, 32], strides = [1, 1]} : vector<1x96xf32> to vector<1x32xf32>
    %164 = arith.addf %162, %163 : vector<1x32xf32>
    %165 = arith.negf %164 : vector<1x32xf32>
    %166 = math.exp %165 : vector<1x32xf32>
    %cst_56 = arith.constant 1.000000e+00 : f32
    %167 = vector.broadcast %cst_56 : f32 to vector<1x32xf32>
    %168 = arith.addf %167, %166 : vector<1x32xf32>
    %169 = arith.divf %167, %168 : vector<1x32xf32>
    %170 = vector.extract_strided_slice %161 {offsets = [0, 32], sizes = [1, 32], strides = [1, 1]} : vector<1x96xf32> to vector<1x32xf32>
    %171 = vector.extract_strided_slice %160 {offsets = [0, 32], sizes = [1, 32], strides = [1, 1]} : vector<1x96xf32> to vector<1x32xf32>
    %172 = arith.addf %170, %171 : vector<1x32xf32>
    %173 = arith.negf %172 : vector<1x32xf32>
    %174 = math.exp %173 : vector<1x32xf32>
    %cst_57 = arith.constant 1.000000e+00 : f32
    %175 = vector.broadcast %cst_57 : f32 to vector<1x32xf32>
    %176 = arith.addf %175, %174 : vector<1x32xf32>
    %177 = arith.divf %175, %176 : vector<1x32xf32>
    %178 = vector.extract_strided_slice %161 {offsets = [0, 64], sizes = [1, 32], strides = [1, 1]} : vector<1x96xf32> to vector<1x32xf32>
    %179 = vector.extract_strided_slice %160 {offsets = [0, 64], sizes = [1, 32], strides = [1, 1]} : vector<1x96xf32> to vector<1x32xf32>
    %180 = arith.mulf %169, %179 : vector<1x32xf32>
    %181 = arith.addf %178, %180 : vector<1x32xf32>
    %182 = math.tanh %181 : vector<1x32xf32>
    %cst_58 = arith.constant 1.000000e+00 : f32
    %183 = vector.broadcast %cst_58 : f32 to vector<1x32xf32>
    %184 = arith.subf %183, %177 : vector<1x32xf32>
    %185 = arith.mulf %184, %182 : vector<1x32xf32>
    %186 = arith.mulf %177, %158 : vector<1x32xf32>
    %187 = arith.addf %185, %186 : vector<1x32xf32>
    %cst_59 = arith.constant dense<0.000000e+00> : vector<1x96xf32>
    %188 = tpu.matmul %187, %98, %cst_59 {dimension_numbers = #tpu.dot_dimension_numbers<[1], [0], [0], [1], [0, 0, 1, 1], [], []>} : vector<1x32xf32>, vector<32x96xf32>, vector<1x96xf32> -> vector<1x96xf32>
    %189 = arith.addf %188, %99 : vector<1x96xf32>
    %190 = vector.extract_strided_slice %97 {offsets = [3, 0], sizes = [1, 96], strides = [1, 1]} : vector<5x96xf32> to vector<1x96xf32>
    %191 = vector.extract_strided_slice %190 {offsets = [0, 0], sizes = [1, 32], strides = [1, 1]} : vector<1x96xf32> to vector<1x32xf32>
    %192 = vector.extract_strided_slice %189 {offsets = [0, 0], sizes = [1, 32], strides = [1, 1]} : vector<1x96xf32> to vector<1x32xf32>
    %193 = arith.addf %191, %192 : vector<1x32xf32>
    %194 = arith.negf %193 : vector<1x32xf32>
    %195 = math.exp %194 : vector<1x32xf32>
    %cst_60 = arith.constant 1.000000e+00 : f32
    %196 = vector.broadcast %cst_60 : f32 to vector<1x32xf32>
    %197 = arith.addf %196, %195 : vector<1x32xf32>
    %198 = arith.divf %196, %197 : vector<1x32xf32>
    %199 = vector.extract_strided_slice %190 {offsets = [0, 32], sizes = [1, 32], strides = [1, 1]} : vector<1x96xf32> to vector<1x32xf32>
    %200 = vector.extract_strided_slice %189 {offsets = [0, 32], sizes = [1, 32], strides = [1, 1]} : vector<1x96xf32> to vector<1x32xf32>
    %201 = arith.addf %199, %200 : vector<1x32xf32>
    %202 = arith.negf %201 : vector<1x32xf32>
    %203 = math.exp %202 : vector<1x32xf32>
    %cst_61 = arith.constant 1.000000e+00 : f32
    %204 = vector.broadcast %cst_61 : f32 to vector<1x32xf32>
    %205 = arith.addf %204, %203 : vector<1x32xf32>
    %206 = arith.divf %204, %205 : vector<1x32xf32>
    %207 = vector.extract_strided_slice %190 {offsets = [0, 64], sizes = [1, 32], strides = [1, 1]} : vector<1x96xf32> to vector<1x32xf32>
    %208 = vector.extract_strided_slice %189 {offsets = [0, 64], sizes = [1, 32], strides = [1, 1]} : vector<1x96xf32> to vector<1x32xf32>
    %209 = arith.mulf %198, %208 : vector<1x32xf32>
    %210 = arith.addf %207, %209 : vector<1x32xf32>
    %211 = math.tanh %210 : vector<1x32xf32>
    %cst_62 = arith.constant 1.000000e+00 : f32
    %212 = vector.broadcast %cst_62 : f32 to vector<1x32xf32>
    %213 = arith.subf %212, %206 : vector<1x32xf32>
    %214 = arith.mulf %213, %211 : vector<1x32xf32>
    %215 = arith.mulf %206, %187 : vector<1x32xf32>
    %216 = arith.addf %214, %215 : vector<1x32xf32>
    %cst_63 = arith.constant dense<0.000000e+00> : vector<1x96xf32>
    %217 = tpu.matmul %216, %98, %cst_63 {dimension_numbers = #tpu.dot_dimension_numbers<[1], [0], [0], [1], [0, 0, 1, 1], [], []>} : vector<1x32xf32>, vector<32x96xf32>, vector<1x96xf32> -> vector<1x96xf32>
    %218 = arith.addf %217, %99 : vector<1x96xf32>
    %219 = vector.extract_strided_slice %97 {offsets = [4, 0], sizes = [1, 96], strides = [1, 1]} : vector<5x96xf32> to vector<1x96xf32>
    %220 = vector.extract_strided_slice %219 {offsets = [0, 0], sizes = [1, 32], strides = [1, 1]} : vector<1x96xf32> to vector<1x32xf32>
    %221 = vector.extract_strided_slice %218 {offsets = [0, 0], sizes = [1, 32], strides = [1, 1]} : vector<1x96xf32> to vector<1x32xf32>
    %222 = arith.addf %220, %221 : vector<1x32xf32>
    %223 = arith.negf %222 : vector<1x32xf32>
    %224 = math.exp %223 : vector<1x32xf32>
    %cst_64 = arith.constant 1.000000e+00 : f32
    %225 = vector.broadcast %cst_64 : f32 to vector<1x32xf32>
    %226 = arith.addf %225, %224 : vector<1x32xf32>
    %227 = arith.divf %225, %226 : vector<1x32xf32>
    %228 = vector.extract_strided_slice %219 {offsets = [0, 32], sizes = [1, 32], strides = [1, 1]} : vector<1x96xf32> to vector<1x32xf32>
    %229 = vector.extract_strided_slice %218 {offsets = [0, 32], sizes = [1, 32], strides = [1, 1]} : vector<1x96xf32> to vector<1x32xf32>
    %230 = arith.addf %228, %229 : vector<1x32xf32>
    %231 = arith.negf %230 : vector<1x32xf32>
    %232 = math.exp %231 : vector<1x32xf32>
    %cst_65 = arith.constant 1.000000e+00 : f32
    %233 = vector.broadcast %cst_65 : f32 to vector<1x32xf32>
    %234 = arith.addf %233, %232 : vector<1x32xf32>
    %235 = arith.divf %233, %234 : vector<1x32xf32>
    %236 = vector.extract_strided_slice %219 {offsets = [0, 64], sizes = [1, 32], strides = [1, 1]} : vector<1x96xf32> to vector<1x32xf32>
    %237 = vector.extract_strided_slice %218 {offsets = [0, 64], sizes = [1, 32], strides = [1, 1]} : vector<1x96xf32> to vector<1x32xf32>
    %238 = arith.mulf %227, %237 : vector<1x32xf32>
    %239 = arith.addf %236, %238 : vector<1x32xf32>
    %240 = math.tanh %239 : vector<1x32xf32>
    %cst_66 = arith.constant 1.000000e+00 : f32
    %241 = vector.broadcast %cst_66 : f32 to vector<1x32xf32>
    %242 = arith.subf %241, %235 : vector<1x32xf32>
    %243 = arith.mulf %242, %240 : vector<1x32xf32>
    %244 = arith.mulf %235, %216 : vector<1x32xf32>
    %245 = arith.addf %243, %244 : vector<1x32xf32>
    %246 = tpu.concatenate %129, %158, %187, %216, %245 in 0 : vector<1x32xf32>, vector<1x32xf32>, vector<1x32xf32>, vector<1x32xf32>, vector<1x32xf32> -> vector<5x32xf32>
    %c0_67 = arith.constant 0 : index
    %c0_68 = arith.constant 0 : index
    %247 = vector.load %arg14[%c0_67, %c0_68] : memref<32x64xf32, #tpu.memory_space<vmem>>, vector<32x64xf32>
    %cst_69 = arith.constant dense<0.000000e+00> : vector<5x64xf32>
    %248 = tpu.matmul %246, %247, %cst_69 {dimension_numbers = #tpu.dot_dimension_numbers<[1], [0], [0], [1], [0, 0, 1, 1], [], []>} : vector<5x32xf32>, vector<32x64xf32>, vector<5x64xf32> -> vector<5x64xf32>
    %c0_70 = arith.constant 0 : index
    %c0_71 = arith.constant 0 : index
    %249 = vector.load %arg15[%c0_70, %c0_71] : memref<1x64xf32, #tpu.memory_space<vmem>>, vector<1x64xf32>
    %250 = vector.broadcast %249 : vector<1x64xf32> to vector<5x64xf32>
    %251 = arith.addf %248, %250 : vector<5x64xf32>
    %cst_72 = arith.constant dense<0xFF800000> : vector<5xf32>
    %252 = vector.multi_reduction <maximumf>, %251, %cst_72 [1] : vector<5x64xf32> to vector<5xf32>
    %253 = vector.shape_cast %252 : vector<5xf32> to vector<5x1xf32>
    %254 = vector.broadcast %253 : vector<5x1xf32> to vector<5x64xf32>
    %255 = arith.subf %251, %254 : vector<5x64xf32>
    %256 = math.exp %255 : vector<5x64xf32>
    %cst_73 = arith.constant dense<0.000000e+00> : vector<5xf32>
    %257 = vector.multi_reduction <add>, %256, %cst_73 [1] : vector<5x64xf32> to vector<5xf32>
    %258 = vector.shape_cast %257 : vector<5xf32> to vector<5x1xf32>
    %259 = vector.broadcast %258 : vector<5x1xf32> to vector<5x64xf32>
    %260 = arith.divf %256, %259 : vector<5x64xf32>
    %cst_74 = arith.constant 0.000000e+00 : f32
    %261 = vector.broadcast %cst_74 : f32 to vector<5x32xf32>
    %262 = tpu.concatenate %260, %246, %261 in 1 : vector<5x64xf32>, vector<5x32xf32>, vector<5x32xf32> -> vector<5x128xf32>
    %c0_75 = arith.constant 0 : index
    %c0_76 = arith.constant 0 : index
    %263 = vector.load %arg16[%c0_75, %c0_76] : memref<5x128xf32, #tpu.memory_space<vmem>>, vector<5x128xf32>
    tpu.vector_store %arg16[%c0_75, %c0_76], %262 {strides = array<i32>} : memref<5x128xf32, #tpu.memory_space<vmem>>, vector<5x128xf32>,
    return
  }
}

</mosaic_0001>

<bundles_post_ra>
// kernel: _forward_impl.1
= control target key start
LH: loop header
LB: loop body
LE: loop exit
PB: predicated region body
PF: predicated region fallthrough
CT: control target
= control target key end

     0   :  { %v2099_v0 = vmov 0.0|0.0   ;;  %vm2100_vm0 = vmmov 0   ;;  %v2101_v8 = vmov 0.0   ;;  %vm67_vm1 = vcmask 261120   ;;  %s2464_s4 = inlined_call_operand.vmem [shape: f32[32,16], index: 4, kind: input, shape index: {}]   ;;  %s2465_s6 = inlined_call_operand.vmem [shape: f32[32,32], index: 6, kind: input, shape index: {}]   ;;  %s2466_s0 = inlined_call_operand.vmem [shape: f32[5,32], index: 0, kind: input, shape index: {}]   ;;  %s2467_s1 = inlined_call_operand.vmem [shape: f32[8,32], index: 1, kind: input, shape index: {}]   ;;  %s2468_s3 = inlined_call_operand.vmem [shape: f32[4,16], index: 3, kind: input, shape index: {}]   ;;  %s2469_s5 = inlined_call_operand.vmem [shape: f32[1,16], index: 5, kind: input, shape index: {}]   ;;  %s2470_s7 = inlined_call_operand.vmem [shape: f32[1,32], index: 7, kind: input, shape index: {}]   ;;  %s2471_s8 = inlined_call_operand.vmem [shape: f32[16,32], index: 8, kind: input, shape index: {}]   ;;  %s2472_s12 = inlined_call_operand.vmem [shape: f32[32,96], index: 12, kind: input, shape index: {}]   ;;  %s2473_s2 = inlined_call_operand.vmem [shape: f32[1,32], index: 2, kind: input, shape index: {}]   ;;  %s2474_s10 = inlined_call_operand.vmem [shape: f32[32,96], index: 10, kind: input, shape index: {}]   ;;  %s2475_s13 = inlined_call_operand.vmem [shape: f32[1,96], index: 13, kind: input, shape index: {}]   ;;  %s2476_s9 = inlined_call_operand.vmem [shape: f32[1,32], index: 9, kind: input, shape index: {}]   ;;  %s2477_s11 = inlined_call_operand.vmem [shape: f32[1,96], index: 11, kind: input, shape index: {}]   ;;  %s2478_s14 = inlined_call_operand.vmem [shape: f32[32,64], index: 14, kind: input, shape index: {}]   ;;  %s2479_s15 = inlined_call_operand.vmem [shape: f32[1,64], index: 15, kind: input, shape index: {}]   ;;  %s2480_s16 = inlined_call_operand.vmem [shape: f32[5,128], index: 16, kind: output, shape index: {}]  }
   0x1   :  { %2482 = sst [smem:[#allocation2_spill]] %s2464_s4  ;;  %1978 = vmatprep.subr.bf16.mxu0 %v2099_v0  ;;  %1984 = vmatprep.subr.bf16.mxu1 %v2099_v0  ;;  %v141_v3 = vld [vmem:[%s2465_s6] sm:$0xff]  ;;  %v142_v5 = vld [vmem:[%s2465_s6 + $0x8] sm:$0xff]  ;;  %v143_v10 = vld [vmem:[%s2465_s6 + $0x10] sm:$0xff]  ;;  %v225_v16 = vlaneseq  ;;  %vm230_vm2 = vcmask 130048   ;;  %vm307_vm3 = vcmask 61440  }
   0x2   :  { %s2483_s23 = sld [smem:[#allocation2_spill]]  ;;  %1840 = vmatprep.mubr.msk.f32.mxu0 %vm2100_vm0, %v2101_v8  ;;  %1851 = vmatprep.mubr.msk.f32.mxu1 %vm2100_vm0, %v2101_v8  ;;  %v1985_v9 = vpack.c.bf16 %v142_v5, %v141_v3  ;;  %v144_v11 = vld [vmem:[%s2465_s6 + $0x18] sm:$0xff]  ;;  %v53_v14 = vld [vmem:[%s2466_s0] sm:$0x1f]  ;;  %vm422_vm4 = vcmask 64512   ;;  %vm1618_vm5 = vcmask 1040384  }
   0x3   :  { %v1988_v13 = vpack.c.bf16 %v144_v11, %v143_v10  ;;  %v54_v15 = vld [vmem:[%s2467_s1] sm:$0xff]  ;;  %v2238_v17 = vshrl.u32 %v225_v16, 7  ;;  %vm1620_vm6 = vcmask 1041408   ;;  %vm1622_vm7 = vcmask 1042432  }
   0x4   :  { %1986 = vmatpush3.bf16.msra.mxu1 %v1985_v9  ;;  %v55_v20 = vld [vmem:[%s2468_s3] sm:$0xf]  ;;  %s2102_s3 = smov 16   ;;  %vm1624_vm8 = vcmask 1043456   ;;  %vm1712_vm9 = vcmask 520192   ;;  %vm1727_vm10 = vcmask 523264  }
   0x5   :  { %1987 = vmatprep.subr.bf16.mxu1 %v2099_v0  ;;  %v227_v18 = vsub.s32 0, %v2238_v17  ;;  %v326_v19 = vsub.s32 1, %v2238_v17  ;;  %v1736_v21 = vld [vmem:[%s2469_s5] ss:$0 sm:$0xff]  ;;  %v575_v27 = vsub.s32 2, %v2238_v17  ;;  %v747_v35 = vsub.s32 3, %v2238_v17 }
   0x6   :  { %v1738_v24 = vld [vmem:[%s2470_s7] ss:$0 sm:$0xff]  ;;  %s2103_s5 = smov 112   ;;  %s2104_s7 = smov 64   ;;  %vm1729_vm11 = vcmask 785408  }
   0x7   :  { %v228_v22 = vrot.slane %v55_v20, %v227_v18  ;;  %v327_v23 = vrot.slane %v55_v20, %v326_v19  ;;  %v576_v34 = vrot.slane %v55_v20, %v575_v27  ;;  %v748_v37 = vrot.slane %v55_v20, %v747_v35  ;;  %v917_v19 = vld [vmem:[%s2471_s8] sm:$0xff]  ;;  %v918_v20 = vld [vmem:[%s2471_s8 + $0x8] sm:$0xff] }
   0x8   :  { %v56_v1 = vld [vmem:[%s2483_s23] sm:$0xff]  ;;  %v57_v2 = vld [vmem:[%s2483_s23 + $0x8] sm:$0xff]  ;;  %v58_v6 = vld [vmem:[%s2483_s23 + $0x10] sm:$0xff]  ;;  %1989 = vmatpush3.bf16.msra.mxu1 %v1988_v13 }
   0x9   :  { %v1979_v4 = vpack.c.bf16 %v57_v2, %v56_v1  ;;  %v59_v7 = vld [vmem:[%s2483_s23 + $0x18] sm:$0xff]  ;;  %1859 = vmatprep.subr.mxu1 %v2101_v8 }
   0xa   :  { %v1982_v12 = vpack.c.bf16 %v59_v7, %v58_v6 }
   0xb   :  { %1980 = vmatpush3.bf16.msra.mxu0 %v1979_v4  ;;  %1852 = vmatmul.mubr.msk.f32.vlgmr.msra.gmra.mrb[0].mxu1 %vm67_vm1, %v54_v15 }
   0xc   :  { %1981 = vmatprep.subr.bf16.mxu0 %v2099_v0  ;;  %1861 = vmatprep.mubr.msk.f32.mxu1 %vm2100_vm0, %v2101_v8 }
   0xf   :  { %1983 = vmatpush3.bf16.msra.mxu0 %v1982_v12 }
  0x10   :  { %1854 = vmatprep.subr.mxu0 %v2101_v8 }
  0x12   :  { %1841 = vmatmul.mubr.msk.f32.vlgmr.msra.gmra.mrb[0].mxu0 %vm67_vm1, %v53_v14 }
  0x13   :  { %1856 = vmatprep.mubr.msk.f32.mxu0 %vm2100_vm0, %v2101_v8 }
  0xde   :  { %v221_v28 = vpop.f32.mrb[0].mxu1 }
  0xdf   :  { %v2254_v30 = vadd.f32 %v1738_v24, %v221_v28  ;;  %v1853_v31 = vpop.f32.mrb[1].mxu1 }
  0xe1   :  { %1855 = vmatpush3.xpose.msk.msra.mxu0 %vm230_vm2, %v2254_v30  ;;  %1860 = vmatpush3.xpose.msk.msra.mxu1 %vm230_vm2, %v2254_v30 }
  0xe2   :  { %1874 = vmatprep.subr.mxu1 %v2101_v8  ;;  %1864 = vmatprep.subr.mxu0 %v2101_v8 }
  0xe5   :  { %v137_v25 = vpop.f32.mrb[0].mxu0 }
  0xe6   :  { %v138_v26 = vadd.f32 %v1736_v21, %v137_v25  ;;  %v1842_v29 = vpop.f32.mrb[1].mxu0  ;;  %v1991_v21 = vpack.c.bf16 %v918_v20, %v917_v19 }
  0xe8   :  { %v229_v32 = vmul.f32 %v228_v22, %v138_v26  ;;  %v328_v33 = vmul.f32 %v327_v23, %v138_v26  ;;  %v577_v36 = vmul.f32 %v576_v34, %v138_v26  ;;  %v749_v38 = vmul.f32 %v748_v37, %v138_v26 }
  0xea   :  { %1857 = vmatmul.mubr.msk.f32.vlgmr.msra.gmra.mrb[2].mxu0 %vm230_vm2, %v229_v32  ;;  %1862 = vmatmul.mubr.msk.f32.vlgmr.msra.gmra.mrb[2].mxu1 %vm230_vm2, %v328_v33 }
  0xeb   :  { %1875 = vmatpush3.xpose.msk.msra.mxu1 %vm230_vm2, %v2254_v30  ;;  %1876 = vmatprep.mubr.msk.f32.mxu1 %vm2100_vm0, %v2101_v8 }
  0xec   :  { %1884 = vmatprep.subr.mxu1 %v2101_v8  ;;  %1866 = vmatprep.mubr.msk.f32.mxu0 %vm2100_vm0, %v2101_v8 }
  0xee   :  { %1877 = vmatmul.mubr.msk.f32.vlgmr.msra.gmra.mrb[4].mxu1 %vm230_vm2, %v577_v36 }
  0xef   :  { %1885 = vmatpush3.xpose.msk.msra.mxu1 %vm230_vm2, %v2254_v30  ;;  %1886 = vmatprep.mubr.msk.f32.mxu1 %vm2100_vm0, %v2101_v8 }
  0xf0   :  { %1990 = vmatprep.subr.bf16.mxu1 %v2099_v0 }
  0xf2   :  { %1887 = vmatmul.mubr.msk.f32.vlgmr.msra.gmra.mrb[6].mxu1 %vm230_vm2, %v749_v38  ;;  %v1083_v38 = vld [vmem:[%s2472_s12] sm:$0xff] }
  0xf3   :  { %1898 = vmatprep.mubr.msk.f32.mxu1 %vm2100_vm0, %v2101_v8  ;;  %1992 = vmatpush3.bf16.msra.mxu1 %v1991_v21 }
  0xf4   :  { %1993 = vmatprep.subr.bf16.mxu1 %v2099_v0 }
 0x1bd   :  { %v303_v39 = vpop.f32.mrb[2].mxu0  ;;  %v398_v40 = vpop.f32.mrb[2].mxu1 }
 0x1be   :  { %v1858_v41 = vpop.f32.mrb[3].mxu0  ;;  %v1863_v42 = vpop.f32.mrb[3].mxu1  ;;  %v402_v43 = vsel %vm307_vm3, %v398_v40, -inf  ;;  %v308_v47 = vsel %vm307_vm3, %v303_v39, -inf }
 0x1bf   :  { %403 = vmax.xlane.f32.xlu0 %v402_v43  ;;  %v1086_v42 = vld [vmem:[%s2472_s12 + $0x18] sm:$0xff] }
 0x1c1   :  { %v647_v44 = vpop.f32.mrb[4].mxu1 }
 0x1c2   :  { %v1878_v45 = vpop.f32.mrb[5].mxu1  ;;  %v651_v46 = vsel %vm307_vm3, %v647_v44, -inf }
 0x1c3   :  { %652 = vmax.xlane.f32.xlu1 %v651_v46  ;;  %309 = vmax.xlane.f32.xlu0 %v308_v47  ;;  %v999_v45 = vld [vmem:[%s2474_s10] sm:$0xff]  ;;  %v1000_v46 = vld [vmem:[%s2474_s10 + $0x8] sm:$0xff] }
 0x1c4   :  { %v1994_v47 = vpack.c.bf16 %v1000_v46, %v999_v45 }
 0x1c5   :  { %v819_v48 = vpop.f32.mrb[6].mxu1 }
 0x1c6   :  { %v1888_v49 = vpop.f32.mrb[7].mxu1  ;;  %v823_v50 = vsel %vm307_vm3, %v819_v48, -inf }
 0x1c7   :  { %824 = vmax.xlane.f32.xlu1 %v823_v50  ;;  %v1001_v50 = vld [vmem:[%s2474_s10 + $0x10] sm:$0xff] }
 0x1d8   :  { %320 = vrot.lane.b32.xlu1 %v228_v22, %s2102_s3 }
 0x1d9   :  { %414 = vrot.lane.b32.xlu0 %v327_v23, %s2102_s3 }
 0x1dc   :  { %663 = vrot.lane.b32.xlu1 %v576_v34, %s2102_s3 }
 0x1e0   :  { %835 = vrot.lane.b32.xlu1 %v748_v37, %s2102_s3 }
 0x24c   :  { %v404_v51 = vpop.xlane.xlu0 %403 }
 0x24d   :  { %v405_v52 = vsub.f32 %v398_v40, %v404_v51  ;;  %v1085_v40 = vld [vmem:[%s2472_s12 + $0x10] sm:$0xff]  ;;  %v1002_v51 = vld [vmem:[%s2474_s10 + $0x18] sm:$0xff] }
 0x24e   :  { %v2331_v43 = vpack.c.bf16 %v1086_v42, %v1085_v40 }
 0x24f   :  { %v406_v53 = vmul.f32 1.442695, %v405_v52  ;;  %v1997_v52 = vpack.c.bf16 %v1002_v51, %v1001_v50 }
 0x250   :  { %v653_v54 = vpop.xlane.xlu1 %652  ;;  %v310_v55 = vpop.xlane.xlu0 %309 }
 0x251   :  { %2049 = vpow2.f32 %v406_v53  ;;  %v654_v56 = vsub.f32 %v647_v44, %v653_v54  ;;  %v311_v57 = vsub.f32 %v303_v39, %v310_v55  ;;  %v1084_v39 = vld [vmem:[%s2472_s12 + $0x8] sm:$0xff]  ;;  %v1088_v44 = vld [vmem:[%s2473_s2] sm:$0x1] }
 0x252   :  { %v2325_v41 = vpack.c.bf16 %v1084_v39, %v1083_v38  ;;  %v2366_v53 = vld [vmem:[%s2475_s13] sm:$0x1] }
 0x253   :  { %v655_v58 = vmul.f32 1.442695, %v654_v56  ;;  %v312_v59 = vmul.f32 1.442695, %v311_v57  ;;  %v1752_v57 = vld [vmem:[%s2476_s9] ss:$0 sm:$0xff] }
 0x254   :  { %v825_v60 = vpop.xlane.xlu1 %824  ;;  %v415_v13 = vpop.permute.xlu0 %414  ;;  %s2105_s9 = smov 32  }
 0x255   :  { %2051 = vpow2.f32 %v655_v58  ;;  %v826_v61 = vsub.f32 %v819_v48, %v825_v60  ;;  %v417_v15 = vmul.f32 %v415_v13, %v2254_v30 }
 0x256   :  { %2053 = vpow2.f32 %v312_v59 }
 0x257   :  { %v827_v62 = vmul.f32 1.442695, %v826_v61  ;;  %v1754_v61 = vld [vmem:[%s2477_s11] ss:$0 sm:$0xff]  ;;  %s2106_s11 = smov 96  }
 0x258   :  { %v321_v9 = vpop.permute.xlu1 %320 }
 0x259   :  { %2055 = vpow2.f32 %v827_v62  ;;  %v323_v11 = vmul.f32 %v321_v9, %v2254_v30 }
 0x25b   :  { %v2050_v63 = vpop.eup %2049 }
 0x25c   :  { %v408_v1 = vsel %vm307_vm3, %v2050_v63, 0.0  ;;  %v664_v10 = vpop.permute.xlu1 %663 }
 0x25d   :  { %409 = vadd.xlane.f32.xlu0 %v408_v1  ;;  %v666_v12 = vmul.f32 %v664_v10, %v2254_v30  ;;  %v1189_v10 = vrot.slane %v1088_v44, %v227_v18 }
 0x25f   :  { %v2052_v2 = vpop.eup %2051 }
 0x260   :  { %v2054_v3 = vpop.eup %2053  ;;  %v657_v4 = vsel %vm307_vm3, %v2052_v2, 0.0  ;;  %v836_v14 = vpop.permute.xlu1 %835 }
 0x261   :  { %658 = vadd.xlane.f32.xlu0 %v657_v4  ;;  %v314_v5 = vsel %vm307_vm3, %v2054_v3, 0.0  ;;  %v838_v16 = vmul.f32 %v836_v14, %v2254_v30 }
 0x262   :  { %315 = vadd.xlane.f32.xlu1 %v314_v5 }
 0x263   :  { %v2056_v6 = vpop.eup %2055 }
 0x264   :  { %v829_v7 = vsel %vm307_vm3, %v2056_v6, 0.0 }
 0x265   :  { %830 = vadd.xlane.f32.xlu0 %v829_v7 }
 0x273   :  { %497 = vrot.lane.b32.xlu1 %v323_v11, %s2103_s5 }
 0x277   :  { %668 = vrot.lane.b32.xlu1 %v666_v12, %s2103_s5 }
 0x27b   :  { %840 = vrot.lane.b32.xlu1 %v838_v16, %s2103_s5  ;;  %419 = vrot.lane.b32.xlu0 %v417_v15, %s2103_s5 }
 0x2ea   :  { %v410_v22 = vpop.xlane.xlu0 %409 }
 0x2eb   :  { %2057 = vrcp.f32 %v410_v22 }
 0x2ee   :  { %v659_v23 = vpop.xlane.xlu0 %658 }
 0x2ef   :  { %v316_v24 = vpop.xlane.xlu1 %315 }
 0x2f0   :  { %2059 = vrcp.f32 %v316_v24 }
 0x2f1   :  { %2061 = vrcp.f32 %v659_v23 }
 0x2f2   :  { %v831_v25 = vpop.xlane.xlu0 %830 }
 0x2f3   :  { %v498_v29 = vpop.permute.xlu1 %497  ;;  %2063 = vrcp.f32 %v831_v25 }
 0x2f5   :  { %v2058_v26 = vpop.eup %2057 }
 0x2f6   :  { %v412_v27 = vmul.f32 %v2058_v26, %v2050_v63  ;;  %v420_v28 = vpop.permute.xlu0 %419 }
 0x2f7   :  { %1865 = vmatpush3.msra.mxu0 %v420_v28  ;;  %v669_v32 = vpop.permute.xlu1 %668 }
 0x2f8   :  { %1867 = vmatmul.mubr.msk.f32.vlgmr.msra.gmra.mrb[4].mxu0 %vm422_vm4, %v412_v27  ;;  %1869 = vmatprep.subr.mxu0 %v2101_v8 }
 0x2f9   :  { %1870 = vmatpush3.msra.mxu0 %v498_v29  ;;  %1871 = vmatprep.mubr.msk.f32.mxu0 %vm2100_vm0, %v2101_v8 }
 0x2fa   :  { %1879 = vmatprep.subr.mxu0 %v2101_v8  ;;  %v2060_v30 = vpop.eup %2059 }
 0x2fb   :  { %v318_v31 = vmul.f32 %v2060_v30, %v2054_v3  ;;  %v2062_v33 = vpop.eup %2061  ;;  %v841_v35 = vpop.permute.xlu1 %840 }
 0x2fc   :  { %v661_v34 = vmul.f32 %v2062_v33, %v2052_v2 }
 0x2fd   :  { %v2064_v36 = vpop.eup %2063 }
 0x2fe   :  { %v833_v37 = vmul.f32 %v2064_v36, %v2056_v6 }
 0x300   :  { %1872 = vmatmul.mubr.msk.f32.vlgmr.msra.gmra.mrb[4].mxu0 %vm422_vm4, %v318_v31 }
 0x301   :  { %1880 = vmatpush3.msra.mxu0 %v669_v32  ;;  %1881 = vmatprep.mubr.msk.f32.mxu0 %vm2100_vm0, %v2101_v8 }
 0x302   :  { %1889 = vmatprep.subr.mxu0 %v2101_v8 }
 0x308   :  { %1882 = vmatmul.mubr.msk.f32.vlgmr.msra.gmra.mrb[4].mxu0 %vm422_vm4, %v661_v34 }
 0x309   :  { %1890 = vmatpush3.msra.mxu0 %v841_v35  ;;  %1891 = vmatprep.mubr.msk.f32.mxu0 %vm2100_vm0, %v2101_v8 }
 0x30a   :  { %1999 = vmatprep.subr.bf16.mxu0 %v2099_v0 }
 0x310   :  { %1892 = vmatmul.mubr.msk.f32.vlgmr.msra.gmra.mrb[4].mxu0 %vm422_vm4, %v833_v37 }
 0x311   :  { %1920 = vmatprep.mubr.msk.f32.mxu0 %vm2100_vm0, %v2101_v8  ;;  %2001 = vmatpush3.bf16.msra.mxu0 %v2325_v41 }
 0x312   :  { %2002 = vmatprep.subr.bf16.mxu0 %v2099_v0 }
 0x315   :  { %2004 = vmatpush3.bf16.msra.mxu0 %v2331_v43 }
 0x316   :  { %2011 = vmatprep.subr.bf16.mxu0 %v2099_v0 }
 0x318   :  { %1921 = vmatmul.mubr.msk.f32.vlgmr.msra.gmra.mrb[6].mxu0 %vm67_vm1, %v1088_v44 }
 0x319   :  { %2013 = vmatpush3.bf16.msra.mxu0 %v2325_v41  ;;  %1942 = vmatprep.mubr.msk.f32.mxu0 %vm2100_vm0, %v2101_v8 }
 0x31a   :  { %2014 = vmatprep.subr.bf16.mxu0 %v2099_v0 }
 0x31d   :  { %2016 = vmatpush3.bf16.msra.mxu0 %v2331_v43 }
 0x31e   :  { %2023 = vmatprep.subr.bf16.mxu0 %v2099_v0 }
 0x3e3   :  { %v912_v48 = vpop.f32.mrb[4].mxu0 }
 0x3e4   :  { %v1893_v49 = vpop.f32.mrb[5].mxu0  ;;  %1899 = vmatmul.mubr.msk.f32.vlgmr.msra.gmra.mrb[8].mxu1 %vm230_vm2, %v912_v48 }
 0x3e5   :  { %1995 = vmatpush3.bf16.msra.mxu1 %v1994_v47  ;;  %1909 = vmatprep.mubr.msk.f32.mxu1 %vm2100_vm0, %v2101_v8 }
 0x3e6   :  { %1996 = vmatprep.subr.bf16.mxu1 %v2099_v0 }
 0x3e9   :  { %1998 = vmatpush3.bf16.msra.mxu1 %v1997_v52 }
 0x3ea   :  { %2005 = vmatprep.subr.bf16.mxu1 %v2099_v0 }
 0x3eb   :  { %v1158_v54 = vpop.f32.mrb[6].mxu0 }
 0x3ec   :  { %v1159_v55 = vadd.f32 %v1158_v54, %v2366_v53  ;;  %v1922_v56 = vpop.f32.mrb[7].mxu0 }
 0x3ee   :  { %1170 = vrot.lane.b32.xlu0 %v1159_v55, %s2104_s7 }
 0x460   :  { %v1171_v6 = vpop.permute.xlu0 %1170 }
 0x4b7   :  { %v995_v58 = vpop.f32.mrb[8].mxu1 }
 0x4b8   :  { %v996_v59 = vadd.f32 %v1752_v57, %v995_v58  ;;  %v1900_v60 = vpop.f32.mrb[9].mxu1 }
 0x4ba   :  { %1910 = vmatmul.mubr.msk.f32.vlgmr.msra.gmra.mrb[10].mxu1 %vm67_vm1, %v996_v59 }
 0x4bb   :  { %2007 = vmatpush3.bf16.msra.mxu1 %v2325_v41  ;;  %1931 = vmatprep.mubr.msk.f32.mxu1 %vm2100_vm0, %v2101_v8 }
 0x4bc   :  { %2008 = vmatprep.subr.bf16.mxu1 %v2099_v0 }
 0x4bf   :  { %2010 = vmatpush3.bf16.msra.mxu1 %v2331_v43 }
 0x4c0   :  { %2017 = vmatprep.subr.bf16.mxu1 %v2099_v0 }
 0x58d   :  { %v1079_v62 = vpop.f32.mrb[10].mxu1 }
 0x58e   :  { %v2383_v63 = vadd.f32 %v1754_v61, %v1079_v62  ;;  %v1911_v1 = vpop.f32.mrb[11].mxu1 }
 0x590   :  { %v1162_v2 = vadd.f32 %v1159_v55, %v2383_v63 }
 0x592   :  { %v1757_v3 = vmul.f32 -1.442695, %v1162_v2 }
 0x594   :  { %2065 = vpow2.f32 %v1757_v3 }
 0x59e   :  { %v2066_v4 = vpop.eup %2065 }
 0x59f   :  { %v1166_v5 = vadd.f32 1.0, %v2066_v4 }
 0x5a1   :  { %2067 = vrcp.f32 %v1166_v5 }
 0x5ab   :  { %v2068_v7 = vpop.eup %2067 }
 0x5ac   :  { %v1173_v9 = vmul.f32 %v2068_v7, %v1171_v6  ;;  %v1180_v15 = vsub.f32 1.0, %v2068_v7 }
 0x5ae   :  { %1175 = vrot.lane.b32.xlu1 %v1173_v9, %s2104_s7 }
 0x5b2   :  { %1190 = vrot.lane.b32.xlu1 %v1189_v10, %s2105_s9 }
 0x620   :  { %v1176_v11 = vpop.permute.xlu1 %1175 }
 0x621   :  { %v1178_v12 = vadd.f32 %v1176_v11, %v2383_v63 }
 0x623   :  { %2069 = vtanh.f32 %v1178_v12 }
 0x624   :  { %v1191_v14 = vpop.permute.xlu1 %1190 }
 0x625   :  { %v1193_v19 = vmul.f32 %v2068_v7, %v1191_v14 }
 0x62d   :  { %v2070_v13 = vpop.eup %2069 }
 0x62e   :  { %1182 = vrot.lane.b32.xlu0 %v2070_v13, %s2106_s11 }
 0x6a0   :  { %v1183_v16 = vpop.permute.xlu0 %1182 }
 0x6a1   :  { %v1185_v20 = vmul.f32 %v1183_v16, %v1180_v15 }
 0x6a3   :  { %v2392_v21 = vadd.f32 %v1193_v19, %v1185_v20 }
 0x6a5   :  { %1196 = vrot.lane.b32.xlu0 %v2392_v21, %s2106_s11  ;;  %v1296_v36 = vrot.slane %v2392_v21, 7 }
 0x717   :  { %v1197_v17 = vpop.permute.xlu0 %1196 }
 0x718   :  { %1932 = vmatmul.mubr.msk.f32.vlgmr.msra.gmra.mrb[12].mxu1 %vm67_vm1, %v1197_v17 }
 0x719   :  { %2019 = vmatpush3.bf16.msra.mxu1 %v2325_v41  ;;  %1953 = vmatprep.mubr.msk.f32.mxu1 %vm2100_vm0, %v2101_v8 }
 0x71a   :  { %2020 = vmatprep.subr.bf16.mxu1 %v2099_v0 }
 0x71d   :  { %2022 = vmatpush3.bf16.msra.mxu1 %v2331_v43 }
 0x71e   :  { %2029 = vmatprep.subr.bf16.mxu1 %v2099_v0 }
 0x7eb   :  { %v1266_v18 = vpop.f32.mrb[12].mxu1 }
 0x7ec   :  { %v1267_v22 = vadd.f32 %v1266_v18, %v2366_v53  ;;  %v1933_v23 = vpop.f32.mrb[13].mxu1 }
 0x7ee   :  { %v1271_v24 = vrot.slane %v1267_v22, 7 }
 0x7f0   :  { %1280 = vrot.lane.b32.xlu1 %v1271_v24, %s2104_s7  ;;  %v1273_v25 = vadd.f32 %v1271_v24, %v2383_v63 }
 0x7f2   :  { %v1759_v26 = vmul.f32 -1.442695, %v1273_v25 }
 0x7f4   :  { %2071 = vpow2.f32 %v1759_v26 }
 0x7fe   :  { %v2072_v27 = vpop.eup %2071 }
 0x7ff   :  { %v1277_v28 = vadd.f32 1.0, %v2072_v27 }
 0x801   :  { %2073 = vrcp.f32 %v1277_v28 }
 0x80b   :  { %v2074_v29 = vpop.eup %2073 }
 0x80c   :  { %v1290_v35 = vsub.f32 1.0, %v2074_v29  ;;  %v1298_v39 = vmul.f32 %v2074_v29, %v1296_v36 }
 0x862   :  { %v1281_v30 = vpop.permute.xlu1 %1280 }
 0x863   :  { %v1283_v31 = vmul.f32 %v2074_v29, %v1281_v30 }
 0x865   :  { %1285 = vrot.lane.b32.xlu0 %v1283_v31, %s2104_s7 }
 0x8d7   :  { %v1286_v32 = vpop.permute.xlu0 %1285 }
 0x8d8   :  { %v1288_v33 = vadd.f32 %v1286_v32, %v2383_v63 }
 0x8da   :  { %2075 = vtanh.f32 %v1288_v33 }
 0x8e4   :  { %v2076_v34 = vpop.eup %2075 }
 0x8e5   :  { %1292 = vrot.lane.b32.xlu1 %v2076_v34, %s2106_s11 }
 0x957   :  { %v1293_v37 = vpop.permute.xlu1 %1292 }
 0x958   :  { %v1295_v38 = vmul.f32 %v1293_v37, %v1290_v35 }
 0x95a   :  { %v1299_v40 = vadd.f32 %v1298_v39, %v1295_v38 }
 0x95c   :  { %v1301_v42 = vrot.slane %v1299_v40, 1  ;;  %v1402_v59 = vrot.slane %v1299_v40, 7  ;;  %v1619_v2 = vsel %vm1618_vm5, %v2392_v21, %v1299_v40 }
 0x95e   :  { %1302 = vrot.lane.b32.xlu0 %v1301_v42, %s2106_s11 }
 0x9d0   :  { %v1303_v44 = vpop.permute.xlu0 %1302 }
 0x9d1   :  { %1943 = vmatmul.mubr.msk.f32.vlgmr.msra.gmra.mrb[8].mxu0 %vm67_vm1, %v1303_v44  ;;  %v1627_v44 = vld [vmem:[%s2478_s14 + $0x8] sm:$0xff] }
 0x9d2   :  { %2025 = vmatpush3.bf16.msra.mxu0 %v2325_v41  ;;  %1964 = vmatprep.mubr.msk.f32.mxu0 %vm2100_vm0, %v2101_v8 }
 0x9d3   :  { %2026 = vmatprep.subr.bf16.mxu0 %v2099_v0 }
 0x9d6   :  { %2028 = vmatpush3.bf16.msra.mxu0 %v2331_v43 }
 0xaa4   :  { %v1372_v45 = vpop.f32.mrb[8].mxu0 }
 0xaa5   :  { %v1373_v46 = vadd.f32 %v1372_v45, %v2366_v53  ;;  %v1944_v47 = vpop.f32.mrb[9].mxu0  ;;  %v1628_v45 = vld [vmem:[%s2478_s14 + $0x10] sm:$0xff] }
 0xaa6   :  { %v1629_v47 = vld [vmem:[%s2478_s14 + $0x18] sm:$0xff] }
 0xaa7   :  { %v1377_v48 = vrot.slane %v1373_v46, 6 }
 0xaa9   :  { %1386 = vrot.lane.b32.xlu1 %v1377_v48, %s2104_s7  ;;  %v1379_v49 = vadd.f32 %v1377_v48, %v2383_v63 }
 0xaab   :  { %v1761_v50 = vmul.f32 -1.442695, %v1379_v49 }
 0xaad   :  { %2077 = vpow2.f32 %v1761_v50 }
 0xab7   :  { %v2078_v51 = vpop.eup %2077 }
 0xab8   :  { %v1383_v41 = vadd.f32 1.0, %v2078_v51 }
 0xaba   :  { %2079 = vrcp.f32 %v1383_v41 }
 0xac4   :  { %v2080_v52 = vpop.eup %2079 }
 0xac5   :  { %v1396_v58 = vsub.f32 1.0, %v2080_v52  ;;  %v1404_v61 = vmul.f32 %v2080_v52, %v1402_v59 }
 0xb1b   :  { %v1387_v54 = vpop.permute.xlu1 %1386 }
 0xb1c   :  { %v1389_v55 = vmul.f32 %v2080_v52, %v1387_v54 }
 0xb1e   :  { %1391 = vrot.lane.b32.xlu0 %v1389_v55, %s2104_s7 }
 0xb90   :  { %v1392_v43 = vpop.permute.xlu0 %1391 }
 0xb91   :  { %v1394_v56 = vadd.f32 %v1392_v43, %v2383_v63 }
 0xb93   :  { %2081 = vtanh.f32 %v1394_v56 }
 0xb9d   :  { %v2082_v57 = vpop.eup %2081 }
 0xb9e   :  { %1398 = vrot.lane.b32.xlu1 %v2082_v57, %s2106_s11 }
 0xc10   :  { %v1399_v60 = vpop.permute.xlu1 %1398 }
 0xc11   :  { %v1401_v62 = vmul.f32 %v1399_v60, %v1396_v58 }
 0xc13   :  { %v1405_v1 = vadd.f32 %v1404_v61, %v1401_v62 }
 0xc15   :  { %v1407_v3 = vrot.slane %v1405_v1, 2  ;;  %v1621_v4 = vsel %vm1620_vm6, %v1619_v2, %v1405_v1  ;;  %v1508_v18 = vrot.slane %v1405_v1, 7 }
 0xc17   :  { %1408 = vrot.lane.b32.xlu0 %v1407_v3, %s2106_s11 }
 0xc89   :  { %v1409_v5 = vpop.permute.xlu0 %1408 }
 0xc8a   :  { %1954 = vmatmul.mubr.msk.f32.vlgmr.msra.gmra.mrb[14].mxu1 %vm67_vm1, %v1409_v5 }
 0xc8b   :  { %1975 = vmatprep.mubr.msk.f32.mxu1 %vm2100_vm0, %v2101_v8 }
 0xd5d   :  { %v1478_v6 = vpop.f32.mrb[14].mxu1 }
 0xd5e   :  { %v1479_v7 = vadd.f32 %v1478_v6, %v2366_v53  ;;  %v1955_v9 = vpop.f32.mrb[15].mxu1 }
 0xd60   :  { %v1483_v10 = vrot.slane %v1479_v7, 5 }
 0xd62   :  { %1492 = vrot.lane.b32.xlu1 %v1483_v10, %s2104_s7  ;;  %v1485_v11 = vadd.f32 %v1483_v10, %v2383_v63 }
 0xd64   :  { %v1763_v12 = vmul.f32 -1.442695, %v1485_v11 }
 0xd66   :  { %2083 = vpow2.f32 %v1763_v12 }
 0xd70   :  { %v2084_v13 = vpop.eup %2083 }
 0xd71   :  { %v1489_v14 = vadd.f32 1.0, %v2084_v13 }
 0xd73   :  { %2085 = vrcp.f32 %v1489_v14 }
 0xd7d   :  { %v2086_v15 = vpop.eup %2085 }
 0xd7e   :  { %v1502_v17 = vsub.f32 1.0, %v2086_v15  ;;  %v1510_v23 = vmul.f32 %v2086_v15, %v1508_v18 }
 0xdd4   :  { %v1493_v16 = vpop.permute.xlu1 %1492 }
 0xdd5   :  { %v1495_v19 = vmul.f32 %v2086_v15, %v1493_v16 }
 0xdd7   :  { %1497 = vrot.lane.b32.xlu0 %v1495_v19, %s2104_s7 }
 0xe49   :  { %v1498_v8 = vpop.permute.xlu0 %1497 }
 0xe4a   :  { %v1500_v20 = vadd.f32 %v1498_v8, %v2383_v63 }
 0xe4c   :  { %2087 = vtanh.f32 %v1500_v20 }
 0xe56   :  { %v2088_v21 = vpop.eup %2087 }
 0xe57   :  { %1504 = vrot.lane.b32.xlu1 %v2088_v21, %s2106_s11 }
 0xec9   :  { %v1505_v22 = vpop.permute.xlu1 %1504 }
 0xeca   :  { %v1507_v24 = vmul.f32 %v1505_v22, %v1502_v17 }
 0xecc   :  { %v1511_v25 = vadd.f32 %v1510_v23, %v1507_v24 }
 0xece   :  { %v1513_v26 = vrot.slane %v1511_v25, 3  ;;  %v1623_v27 = vsel %vm1622_vm7, %v1621_v4, %v1511_v25  ;;  %v1614_v50 = vrot.slane %v1511_v25, 7 }
 0xed0   :  { %1514 = vrot.lane.b32.xlu0 %v1513_v26, %s2106_s11 }
 0xf42   :  { %v1515_v28 = vpop.permute.xlu0 %1514 }
 0xf43   :  { %1965 = vmatmul.mubr.msk.f32.vlgmr.msra.gmra.mrb[10].mxu0 %vm67_vm1, %v1515_v28 }
0x1016   :  { %v1584_v29 = vpop.f32.mrb[10].mxu0 }
0x1017   :  { %v1585_v30 = vadd.f32 %v1584_v29, %v2366_v53  ;;  %v1966_v31 = vpop.f32.mrb[11].mxu0  ;;  %v1626_v53 = vld [vmem:[%s2478_s14] sm:$0xff] }
0x1018   :  { %v2030_v46 = vpack.c.bf16 %v1627_v44, %v1626_v53 }
0x1019   :  { %v1589_v32 = vrot.slane %v1585_v30, 4 }
0x101a   :  { %2031 = vmatpush3.bf16.msra.mxu1 %v2030_v46 }
0x101b   :  { %1598 = vrot.lane.b32.xlu1 %v1589_v32, %s2104_s7  ;;  %v1591_v33 = vadd.f32 %v1589_v32, %v2383_v63  ;;  %2032 = vmatprep.subr.bf16.mxu1 %v2099_v0  ;;  %v1766_v0 = vld [vmem:[%s2479_s15] ss:$0 sm:$0xff] }
0x101d   :  { %v1765_v34 = vmul.f32 -1.442695, %v1591_v33 }
0x101f   :  { %2089 = vpow2.f32 %v1765_v34 }
0x1029   :  { %v2090_v35 = vpop.eup %2089 }
0x102a   :  { %v1595_v36 = vadd.f32 1.0, %v2090_v35 }
0x102c   :  { %2091 = vrcp.f32 %v1595_v36 }
0x1036   :  { %v2092_v37 = vpop.eup %2091 }
0x1037   :  { %v1608_v49 = vsub.f32 1.0, %v2092_v37  ;;  %v1616_v41 = vmul.f32 %v2092_v37, %v1614_v50 }
0x108d   :  { %v1599_v38 = vpop.permute.xlu1 %1598 }
0x108e   :  { %v1601_v39 = vmul.f32 %v2092_v37, %v1599_v38 }
0x1090   :  { %1603 = vrot.lane.b32.xlu0 %v1601_v39, %s2104_s7 }
0x1102   :  { %v1604_v40 = vpop.permute.xlu0 %1603 }
0x1103   :  { %v1606_v42 = vadd.f32 %v1604_v40, %v2383_v63  ;;  %v2033_v63 = vpack.c.bf16 %v1629_v47, %v1628_v45 }
0x1105   :  { %2093 = vtanh.f32 %v1606_v42  ;;  %2034 = vmatpush3.bf16.msra.mxu1 %v2033_v63 }
0x110f   :  { %v2094_v48 = vpop.eup %2093 }
0x1110   :  { %1610 = vrot.lane.b32.xlu1 %v2094_v48, %s2106_s11 }
0x1182   :  { %v1611_v51 = vpop.permute.xlu1 %1610 }
0x1183   :  { %v1613_v52 = vmul.f32 %v1611_v51, %v1608_v49 }
0x1185   :  { %v1617_v54 = vadd.f32 %v1616_v41, %v1613_v52 }
0x1187   :  { %v1625_v55 = vsel %vm1624_vm8, %v1623_v27, %v1617_v54 }
0x1188   :  { %1638 = vrot.lane.b32.xlu0 %v1625_v55, %s2106_s11 }
0x11fa   :  { %v1639_v43 = vpop.permute.xlu0 %1638 }
0x11fb   :  { %1976 = vmatmul.mubr.msk.f32.vlgmr.msra.gmra.mrb[16].mxu1 %vm67_vm1, %v1639_v43 }
0x12ce   :  { %v1708_v56 = vpop.f32.mrb[16].mxu1 }
0x12cf   :  { %v1709_v57 = vadd.f32 %v1766_v0, %v1708_v56  ;;  %v1977_v58 = vpop.f32.mrb[17].mxu1 }
0x12d1   :  { %v1713_v59 = vsel %vm1712_vm9, %v1709_v57, -inf }
0x12d2   :  { %1714 = vmax.xlane.f32.xlu1 %v1713_v59 }
0x135f   :  { %v1715_v60 = vpop.xlane.xlu1 %1714 }
0x1360   :  { %v1716_v61 = vsub.f32 %v1709_v57, %v1715_v60 }
0x1362   :  { %v1717_v62 = vmul.f32 1.442695, %v1716_v61 }
0x1364   :  { %2095 = vpow2.f32 %v1717_v62 }
0x136e   :  { %v2096_v1 = vpop.eup %2095 }
0x136f   :  { %v1719_v2 = vsel %vm1712_vm9, %v2096_v1, 0.0 }
0x1370   :  { %1720 = vadd.xlane.f32.xlu0 %v1719_v2 }
0x1386   :  { %1724 = vrot.lane.b32.xlu0 %v1625_v55, %s2105_s9 }
0x13fd   :  { %v1721_v3 = vpop.xlane.xlu0 %1720 }
0x13fe   :  { %2097 = vrcp.f32 %v1721_v3 }
0x1401   :  { %v1725_v6 = vpop.permute.xlu0 %1724 }
0x1408   :  { %v2098_v4 = vpop.eup %2097 }
0x1409   :  { %v1723_v5 = vmul.f32 %v2098_v4, %v2096_v1 }
0x140b   :  { %v1728_v7 = vsel %vm1727_vm10, %v1723_v5, %v1725_v6 }
0x140c   :  { %v1730_v9 = vsel %vm1729_vm11, %v1728_v7, 0.0 }
0x140d   :  { %1731 = vst [vmem:[%s2480_s16] sm:$0x1f] %v1730_v9 }

</bundles_post_ra>
